<compile_context>
chip_gen: v7x
topology: tpu7x:2x2x1
jax: 0.10.0
libtpu: 0.0.40
codegen_flags: <defaults>
</compile_context>

<pallas_src>
import functools

import jax
import jax.numpy as jnp
from jax.experimental import pallas as pl
from jax.experimental.pallas import tpu as pltpu


def _static_int_pow(x, n):
    """x**n for a static positive integer n via repeated multiply.

    Exact for negative x (matches torch.pow with integer-valued exponent),
    avoids EUP exp/log transcendentals.
    """
    assert n >= 1
    result = None
    base = x
    while n > 0:
        if n & 1:
            result = base if result is None else result * base
        n >>= 1
        if n:
            base = base * base
    return result


def _lppool1d_kernel(x_ref, pool_ref, o_ref, *, norm_type):
    # x_ref:    (TILE_R, L)          input tile
    # pool_ref: (L, L_OUT_PAD)       band matrix (windowed-sum operator)
    # o_ref:    (TILE_R, L_OUT_PAD)  output tile (lane-dense, padded)
    x = x_ref[...].astype(jnp.float32)

    p = float(norm_type)
    if p == int(p) and int(p) >= 1:
        xp = _static_int_pow(x, int(p))          # exact, VPU-only
    else:
        # Non-integer p: NaN for negative inputs, same as torch.pow.
        xp = jnp.power(x, p)

    # Windowed sum over the length axis as a single MXU matmul.
    s = jnp.dot(xp, pool_ref[...], preferred_element_type=jnp.float32)

    if p == 1.0:
        out = s
    elif p == 2.0:
        out = jnp.sqrt(s)                        # single EUP op
    else:
        # Negative window sums (odd / non-integer p) give NaN, matching
        # PyTorch's forward behavior.
        out = jnp.power(s, 1.0 / p)

    o_ref[...] = out.astype(o_ref.dtype)


def lp_pool1d(x, norm_type, kernel_size, stride=None, ceil_mode=False):
    """x: (N, C, L) array. Returns (N, C, L_out)."""
    if stride is None:
        stride = kernel_size
    if ceil_mode:
        # TODO(synk): ceil_mode=True (F.avg_pool1d ceil-mode divisor
        # semantics) is not reproduced; only ceil_mode=False is supported.
        raise NotImplementedError("ceil_mode=True not supported")
    kernel_size = int(kernel_size)
    stride = int(stride)

    N, C, L = x.shape
    l_out = (L - kernel_size) // stride + 1
    assert l_out >= 1, "kernel_size larger than input length"

    rows = N * C
    itemsize = jnp.dtype(x.dtype).itemsize

    # Lane-dense output width (multiple of 128) -> unmasked full-width stores.
    l_out_pad = ((l_out + 127) // 128) * 128

    # Row-tile size: multiple of 8, sized so the double-buffered working set
    # stays well under the scoped-VMEM default on every generation (incl.
    # v7x's 64 MiB physical / 32 MiB default).
    budget = 8 << 20  # ~8 MiB of tile data
    per_row = ((L + l_out_pad) * itemsize) * 2 + (L + l_out_pad) * 4  # I/O dbl-buf + f32 temps
    tile_r = max(8, min(512, (budget // max(per_row, 1)) // 8 * 8))
    rows_r8 = ((rows + 7) // 8) * 8
    tile_r = min(tile_r, rows_r8)
    rows_pad = ((rows + tile_r - 1) // tile_r) * tile_r

    x2d = x.reshape(rows, L)
    if rows_pad != rows:
        x2d = jnp.pad(x2d, ((0, rows_pad - rows), (0, 0)))

    # Band matrix: P[i, j] = 1 iff j*stride <= i < j*stride + kernel_size,
    # with zero columns for the lane padding (j >= l_out).
    i_idx = jnp.arange(L)[:, None]
    j_idx = jnp.arange(l_out_pad)[None, :]
    start = j_idx * stride
    pool_mat = ((i_idx >= start) & (i_idx < start + kernel_size)
                & (j_idx < l_out)).astype(jnp.float32)

    kernel = functools.partial(_lppool1d_kernel, norm_type=float(norm_type))

    grid = (rows_pad // tile_r,)
    cost = pl.CostEstimate(
        flops=2 * rows_pad * L * l_out_pad + rows_pad * L,
        transcendentals=rows_pad * l_out_pad,
        bytes_accessed=(rows_pad * L + rows_pad * l_out_pad
                        + L * l_out_pad) * itemsize,
    )

    out2d = pl.pallas_call(
        kernel,
        out_shape=jax.ShapeDtypeStruct((rows_pad, l_out_pad), x.dtype),
        grid_spec=pltpu.PrefetchScalarGridSpec(
            num_scalar_prefetch=0,
            grid=grid,
            in_specs=[
                pl.BlockSpec((tile_r, L), lambda i: (i, 0)),
                pl.BlockSpec((L, l_out_pad), lambda i: (0, 0)),
            ],
            out_specs=pl.BlockSpec((tile_r, l_out_pad), lambda i: (i, 0)),
        ),
        compiler_params=pltpu.CompilerParams(
            dimension_semantics=("parallel",)),
        cost_estimate=cost,
    )(x2d, pool_mat)

    return out2d[:rows, :l_out].reshape(N, C, l_out)


if __name__ == "__main__":
    # power-2 pool of window of length 3, with stride 2 (docstring example,
    # at small shapes).
    norm_type = 2.0
    kernel_size = 3
    stride = 2

    key = jax.random.PRNGKey(0)
    N, C, L = 2, 4, 16
    x = jax.random.normal(key, (N, C, L), dtype=jnp.float32)

    out = lp_pool1d(x, norm_type, kernel_size, stride=stride, ceil_mode=False)
    out = jax.block_until_ready(out)

    # In-script sanity check against a pure-JAX reference (p = 2).
    l_out = (L - kernel_size) // stride + 1
    windows = jnp.stack(
        [x[:, :, j * stride:j * stride + kernel_size] for j in range(l_out)],
        axis=2)  # (N, C, L_out, k)
    ref = jnp.sqrt(jnp.sum(windows * windows, axis=-1))

    assert out.shape == (N, C, l_out)
    assert jnp.allclose(out, ref, atol=1e-5, rtol=1e-5)

    print("KERNEL_OK")
</pallas_src>

<mosaic_0001>
module attributes {stable_mosaic.version = 11 : i64} {
  func.func @_lppool1d_kernel(%arg0: i32, %arg1: memref<8x16xf32, #tpu.memory_space<vmem>>, %arg2: memref<16x128xf32, #tpu.memory_space<vmem>>, %arg3: memref<8x128xf32, #tpu.memory_space<vmem>>) attributes {dimension_semantics = [#tpu.dimension_semantics<parallel>], iteration_bounds = array<i64: 1>, scalar_prefetch = 0 : i64, scratch_operands = 0 : i64, tpu.core_type = #tpu.core_type<tc>, window_params = [{transform_indices = @transform_0, window_bounds = array<i64: 8, 16>}, {pipeline_mode = #tpu.pipeline_mode<synchronous>, transform_indices = @transform_1, window_bounds = array<i64: 16, 128>}, {transform_indices = @transform_2, window_bounds = array<i64: 8, 128>}]} {
    %c0 = arith.constant 0 : index
    %c0_0 = arith.constant 0 : index
    %0 = vector.load %arg1[%c0, %c0_0] : memref<8x16xf32, #tpu.memory_space<vmem>>, vector<8x16xf32>
    %1 = arith.mulf %0, %0 : vector<8x16xf32>
    %c0_1 = arith.constant 0 : index
    %c0_2 = arith.constant 0 : index
    %2 = vector.load %arg2[%c0_1, %c0_2] : memref<16x128xf32, #tpu.memory_space<vmem>>, vector<16x128xf32>
    %cst = arith.constant dense<0.000000e+00> : vector<8x128xf32>
    %3 = tpu.matmul %1, %2, %cst {dimension_numbers = #tpu.dot_dimension_numbers<[1], [0], [0], [1], [0, 0, 1, 1], [], []>} : vector<8x16xf32>, vector<16x128xf32>, vector<8x128xf32> -> vector<8x128xf32>
    %4 = math.sqrt %3 : vector<8x128xf32>
    %c0_3 = arith.constant 0 : index
    %c0_4 = arith.constant 0 : index
    %5 = vector.load %arg3[%c0_3, %c0_4] : memref<8x128xf32, #tpu.memory_space<vmem>>, vector<8x128xf32>
    tpu.vector_store %arg3[%c0_3, %c0_4], %4 {strides = array<i32>} : memref<8x128xf32, #tpu.memory_space<vmem>>, vector<8x128xf32>,
    return
  }
  func.func @transform_0(%arg0: i32) -> (i32, i32) {
    %c0_i32 = arith.constant 0 : i32
    %c0_i32_0 = arith.constant 0 : i32
    return %arg0, %c0_i32 : i32, i32
  }
  func.func @transform_1(%arg0: i32) -> (i32, i32) {
    %c0_i32 = arith.constant 0 : i32
    %c0_i32_0 = arith.constant 0 : i32
    %c0_i32_1 = arith.constant 0 : i32
    return %c0_i32, %c0_i32_0 : i32, i32
  }
  func.func @transform_2(%arg0: i32) -> (i32, i32) {
    %c0_i32 = arith.constant 0 : i32
    %c0_i32_0 = arith.constant 0 : i32
    return %arg0, %c0_i32 : i32, i32
  }
}

</mosaic_0001>

<bundles_post_ra>
// kernel: tpu_custom_call.1
= control target key start
LH: loop header
LB: loop body
LE: loop exit
PB: predicated region body
PF: predicated region fallthrough
CT: control target
= control target key end

     0   :  { %7 = vsyncpa [#allocation3], 0  ;;  %s302_s0 = inlined_call_operand.hbm [shape: f32[8,16], index: 0, kind: input, shape index: {}]   ;;  %s303_s1 = inlined_call_operand.hbm [shape: f32[16,128], index: 1, kind: input, shape index: {}]   ;;  %s304_s2 = inlined_call_operand.hbm [shape: f32[8,128], index: 2, kind: output, shape index: {}]  }
   0x1   :  { %8 = vsyncpa [#allocation6], 0 }
   0x2   :  { %9 = vsyncpa [#allocation4], 0  ;;  %s236_s9 = smov [#allocation2]   ;;  %s237_s11 = smov [#allocation5]  }
   0x3   :  { %s16_s10 = sshll.u32 %s236_s9, 4  ;;  %s25_s12 = sshll.u32 %s237_s11, 4  ;;  %s17_s10 = int_to_ptr.vmem [resolvable:$true] %s16_s10  ;;  %s259_s12 = int_to_ptr.vmem [resolvable:$true] %s25_s12 }
   0x4   :  { %s164_s15 = scalar_lea.hbm %s302_s0, 128 }
   0x5   :  { %p165_p0 = scmp.ne.s32.totalorder %s302_s0, %s164_s15  ;;  %p168_p1 = scmp.lt.u32.totalorder %s164_s15, %s302_s0 }
   0x7   :  { %p170_p2 = pnand %p168_p1, %p165_p0 }
   0x9   :  { %173 = shalt.err (!%p170_p2)
}
   0xa   :  { %s174_s20 = scalar_lea.vmem %s17_s10, 128  ;;  %p179_p4 = scmp.lt.s32.totalorder %s17_s10, %s17_s10 }
   0xb   :  { %p175_p3 = scmp.ne.s32.totalorder %s17_s10, %s174_s20  ;;  %p180_p5 = scmp.lt.s32.totalorder %s174_s20, %s174_s20 }
   0xd   :  { %p181_p6 = por %p180_p5, %p179_p4 }
   0xf   :  { %p182_p7 = pnand %p181_p6, %p175_p3 }
  0x11   :  { %185 = shalt.err (!%p182_p7)
}
  0x12   :  { %19 = dma.hbm_to_vmem [thread:$0]  %s302_s0, 128, %s17_s10, [#allocation3]  }
  0x13   :  { %s186_s25 = scalar_lea.hbm %s303_s1, 256 }
  0x14   :  { %p187_p8 = scmp.ne.s32.totalorder %s303_s1, %s186_s25  ;;  %p190_p9 = scmp.lt.u32.totalorder %s186_s25, %s303_s1 }
  0x16   :  { %p192_p10 = pnand %p190_p9, %p187_p8 }
  0x18   :  { %195 = shalt.err (!%p192_p10)
}
  0x19   :  { %s196_s30 = scalar_lea.vmem %s259_s12, 256  ;;  %p201_p12 = scmp.lt.s32.totalorder %s259_s12, %s259_s12 }
  0x1a   :  { %p197_p11 = scmp.ne.s32.totalorder %s259_s12, %s196_s30  ;;  %p202_p13 = scmp.lt.s32.totalorder %s196_s30, %s196_s30 }
  0x1c   :  { %p203_p0 = por %p202_p13, %p201_p12 }
  0x1e   :  { %p204_p1 = pnand %p203_p0, %p197_p11 }
  0x20   :  { %207 = shalt.err (!%p204_p1)
}
  0x21   :  { %s238_s0 = smov 128   ;;  %s239_s3 = smov 8  }
  0x22   :  { %31 = dma.hbm_to_vmem [thread:$0]  %s303_s1, 256, %s259_s12, [#allocation6], %s238_s0, %s238_s0, %s239_s3  }
  0x23   :  { %230 = dma.done.wait [#allocation3], 128  }
  0x24   :  { %231 = vsyncadd [#allocation3], 4294967168 }
  0x25   :  { %232 = dma.done.wait [#allocation6], 256  }
  0x26   :  { %233 = vsyncadd [#allocation6], 4294967040  ;;  %v240_v0 = vmov 0.0|0.0   ;;  %vm241_vm0 = vmmov 0   ;;  %v242_v1 = vmov 0.0   ;;  %v40_v2 = vld [vmem:[#allocation5] sm:$0xff] }
  0x27   :  { %151 = vmatprep.subr.bf16.mxu0 %v240_v0  ;;  %148 = vmatprep.mubr.msk.f32.mxu0 %vm241_vm0, %v242_v1  ;;  %v41_v3 = vld [vmem:[#allocation5 + $0x8] sm:$0xff]  ;;  %v38_v4 = vld [vmem:[#allocation2] sm:$0xff]  ;;  %vm42_vm1 = vcmask 130048   ;;  %s243_s1 = smov [#allocation7]  }
  0x28   :  { %v152_v5 = vpack.c.bf16 %v41_v3, %v40_v2  ;;  %v39_v6 = vmul.f32 %v38_v4, %v38_v4  ;;  %s130_s6 = sshll.u32 %s243_s1, 4  ;;  %s131_s6 = int_to_ptr.vmem [resolvable:$true] %s130_s6 }
  0x29   :  { %s208_s7 = scalar_lea.vmem %s131_s6, 128  ;;  %p213_p3 = scmp.lt.s32.totalorder %s131_s6, %s131_s6 }
  0x2a   :  { %153 = vmatpush3.bf16.msra.mxu0 %v152_v5  ;;  %p209_p2 = scmp.ne.s32.totalorder %s131_s6, %s208_s7  ;;  %p214_p4 = scmp.lt.s32.totalorder %s208_s7, %s208_s7 }
  0x2c   :  { %p215_p5 = por %p214_p4, %p213_p3 }
  0x2d   :  { %149 = vmatmul.mubr.msk.f32.vlgmr.msra.gmra.mrb[0].mxu0 %vm42_vm1, %v39_v6 }
  0x2e   :  { %p216_p6 = pnand %p215_p5, %p209_p2 }
 0x100   :  { %v112_v7 = vpop.f32.mrb[0].mxu0 }
 0x101   :  { %162 = vrsqrt.f32 %v112_v7  ;;  %v150_v8 = vpop.f32.mrb[1].mxu0  ;;  %vm118_vm2 = vcmp.eq.f32.partialorder %v112_v7, inf  ;;  %v121_v11 = vand.u32 2147483648, %v112_v7  ;;  %vm120_vm3 = vcmp.eq.f32.partialorder %v112_v7, 0.0 }
 0x10b   :  { %v163_v9 = vpop.eup %162 }
 0x10c   :  { %v117_v10 = vmul.f32 %v163_v9, %v112_v7 }
 0x10e   :  { %v119_v12 = vsel %vm118_vm2, %v112_v7, %v117_v10 }
 0x10f   :  { %v122_v13 = vsel %vm120_vm3, %v121_v11, %v119_v12 }
 0x110   :  { %123 = vst [vmem:[#allocation7] sm:$0xff] %v122_v13 }
 0x111   :  { %219 = shalt.err (!%p216_p6)
}
 0x112   :  { %s220_s10 = scalar_lea.hbm %s304_s2, 128 }
 0x113   :  { %p221_p7 = scmp.ne.s32.totalorder %s304_s2, %s220_s10  ;;  %p224_p8 = scmp.lt.u32.totalorder %s220_s10, %s304_s2 }
 0x115   :  { %p226_p9 = pnand %p224_p8, %p221_p7 }
 0x117   :  { %229 = shalt.err (!%p226_p9)
}
 0x118   :  { %133 = dma.vmem_to_hbm [thread:$0]  %s131_s6, 128, %s304_s2, [#allocation4]  }
 0x119   :  { %234 = dma.done.wait [#allocation4], 128  }
 0x11a   :  { %235 = vsyncadd [#allocation4], 4294967168 }
 0x11b   :  { %137 = vsyncpa [#allocation3], 1 }
 0x11c   :  { %138 = vsyncpa [#allocation6], 1 }
 0x11d   :  { %139 = vsyncpa [#allocation4], 1 }

</bundles_post_ra>
